<compile_context>
chip_gen: v7x
topology: tpu7x:2x2x1
jax: 0.10.0
libtpu: 0.0.40
codegen_flags: <defaults>
</compile_context>

<pallas_src>
import functools

import jax
import jax.numpy as jnp
from jax.experimental import pallas as pl
from jax.experimental.pallas import tpu as pltpu

LN_EPS = 1e-5   # torch.nn.LayerNorm default


def _round_up(x, m):
    return ((x + m - 1) // m) * m


def mlp_kernel(x_ref,
               w1_ref, b1_ref,
               w2_ref, b2_ref,
               w3_ref, b3_ref,
               gamma_ref, beta_ref,
               o_ref):
    """One (tile_n, d_in) row tile: 3x Linear (+ReLU on first two) + LayerNorm."""
    x = x_ref[...].astype(jnp.bfloat16)                  # f32 in HBM, bf16 on MXU

    # Layer 1: Linear + ReLU (bf16 MXU inputs, f32 accumulate, f32 elementwise)
    h = jnp.dot(x, w1_ref[...], preferred_element_type=jnp.float32) + b1_ref[...]
    h = jnp.maximum(h, 0.0)

    # Layer 2: Linear + ReLU
    h = jnp.dot(h.astype(jnp.bfloat16), w2_ref[...],
                preferred_element_type=jnp.float32) + b2_ref[...]
    h = jnp.maximum(h, 0.0)

    # Layer 3: final Linear (no activation)
    y = jnp.dot(h.astype(jnp.bfloat16), w3_ref[...],
                preferred_element_type=jnp.float32) + b3_ref[...]

    # LayerNorm over the real (unpadded) last dim.
    mean = jnp.mean(y, axis=-1, keepdims=True)
    centered = y - mean
    var = jnp.mean(centered * centered, axis=-1, keepdims=True)
    y_norm = centered * jax.lax.rsqrt(var + LN_EPS)

    o_ref[...] = (y_norm * gamma_ref[...] + beta_ref[...]).astype(o_ref.dtype)


def prepare_kernel_params(params):
    """One-time layout/dtype prep, hoisted out of the forward call path:
    weights -> bf16 [in, out]; biases / LN affine -> f32 [1, out]."""
    return {
        "w1": params["w1"].astype(jnp.bfloat16),
        "b1": params["b1"].reshape(1, -1).astype(jnp.float32),
        "w2": params["w2"].astype(jnp.bfloat16),
        "b2": params["b2"].reshape(1, -1).astype(jnp.float32),
        "w3": params["w3"].astype(jnp.bfloat16),
        "b3": params["b3"].reshape(1, -1).astype(jnp.float32),
        "gamma": params["gamma"].reshape(1, -1).astype(jnp.float32),
        "beta": params["beta"].reshape(1, -1).astype(jnp.float32),
    }


def mlp_forward(x, kparams, tile_n=2048, out_dtype=jnp.float32):
    """x: [N, D_in] float32.  kparams: output of prepare_kernel_params."""
    n, d_in = x.shape
    h1 = kparams["w1"].shape[1]
    h2 = kparams["w2"].shape[1]
    d_out = kparams["w3"].shape[1]

    # Row tile: multiple of 8 sublanes (f32 x / f32 out), capped by problem size.
    tile_n = min(tile_n, _round_up(n, 8))
    tile_n = _round_up(tile_n, 8)
    grid = (pl.cdiv(n, tile_n),)   # partial tail tile handled by masked stores

    # Real (unpadded) work estimate for XLA scheduling around the custom call.
    flops = 2 * n * (d_in * h1 + h1 * h2 + h2 * d_out)
    bytes_accessed = (
        n * d_in * 4                                   # x (f32)
        + (d_in * h1 + h1 * h2 + h2 * d_out) * 2       # weights (bf16)
        + (h1 + h2 + 3 * d_out) * 4                    # biases + gamma/beta (f32)
        + n * d_out * jnp.dtype(out_dtype).itemsize)   # output

    resident = lambda i: (0, 0)        # weights / biases: same block every step
    out = pl.pallas_call(
        mlp_kernel,
        out_shape=jax.ShapeDtypeStruct((n, d_out), out_dtype),
        grid=grid,
        in_specs=[
            pl.BlockSpec((tile_n, d_in), lambda i: (i, 0)),   # x row tile
            pl.BlockSpec((d_in, h1), resident),               # w1
            pl.BlockSpec((1, h1), resident),                  # b1
            pl.BlockSpec((h1, h2), resident),                 # w2
            pl.BlockSpec((1, h2), resident),                  # b2
            pl.BlockSpec((h2, d_out), resident),              # w3
            pl.BlockSpec((1, d_out), resident),               # b3
            pl.BlockSpec((1, d_out), resident),               # gamma
            pl.BlockSpec((1, d_out), resident),               # beta
        ],
        out_specs=pl.BlockSpec((tile_n, d_out), lambda i: (i, 0)),
        compiler_params=pltpu.CompilerParams(
            dimension_semantics=("parallel",)),               # v7x megacore
        cost_estimate=pl.CostEstimate(
            flops=flops, transcendentals=n, bytes_accessed=bytes_accessed),
    )(x, kparams["w1"], kparams["b1"], kparams["w2"], kparams["b2"],
      kparams["w3"], kparams["b3"], kparams["gamma"], kparams["beta"])

    return out


def init_params(key, input_size, widths):
    """Deterministic synthetic init (module semantics, f32).  Linear weights are
    stored as [in, out] (transposed vs. torch's [out, in]) so we do x @ W + b."""
    assert len(widths) == 3, "this script hard-wires a 3-layer MLP kernel"
    dims = [input_size] + list(widths)
    keys = jax.random.split(key, 6)
    params = {}
    for i in range(3):
        fan_in = dims[i]
        bound = 1.0 / jnp.sqrt(fan_in)
        params[f"w{i+1}"] = jax.random.uniform(
            keys[2 * i], (dims[i], dims[i + 1]), jnp.float32, -bound, bound)
        params[f"b{i+1}"] = jax.random.uniform(
            keys[2 * i + 1], (1, dims[i + 1]), jnp.float32, -bound, bound)
    # LayerNorm affine params (torch default init: gamma=1, beta=0)
    params["gamma"] = jnp.ones((1, dims[-1]), jnp.float32)
    params["beta"] = jnp.zeros((1, dims[-1]), jnp.float32)
    return params


def _layernorm(y, gamma, beta):
    mean = jnp.mean(y, axis=-1, keepdims=True)
    var = jnp.mean((y - mean) ** 2, axis=-1, keepdims=True)
    return (y - mean) * jax.lax.rsqrt(var + LN_EPS) * gamma + beta


def mlp_reference_f32(x, params):
    """Plain-JAX f32 reference (exact module semantics)."""
    h = jnp.maximum(x @ params["w1"] + params["b1"], 0.0)
    h = jnp.maximum(h @ params["w2"] + params["b2"], 0.0)
    y = h @ params["w3"] + params["b3"]
    return _layernorm(y, params["gamma"], params["beta"])


def mlp_reference_bf16(x, params):
    """Reference with the same bf16-matmul / f32-accumulate recipe as the kernel."""
    bf = jnp.bfloat16
    h = jnp.dot(x.astype(bf), params["w1"].astype(bf),
                preferred_element_type=jnp.float32) + params["b1"]
    h = jnp.maximum(h, 0.0)
    h = jnp.dot(h.astype(bf), params["w2"].astype(bf),
                preferred_element_type=jnp.float32) + params["b2"]
    h = jnp.maximum(h, 0.0)
    y = jnp.dot(h.astype(bf), params["w3"].astype(bf),
                preferred_element_type=jnp.float32) + params["b3"]
    return _layernorm(y, params["gamma"], params["beta"])


if __name__ == "__main__":
    key = jax.random.PRNGKey(0)
    k_x, k_p = jax.random.split(key)

    input_size = 16
    widths = [32, 32, 16]      # two Linear+ReLU layers, final Linear, LayerNorm
    n = 8                      # number of rows (tokens / nodes)

    x = jax.random.normal(k_x, (n, input_size), jnp.float32)
    params = init_params(k_p, input_size, widths)
    kparams = prepare_kernel_params(params)   # one-time, hoisted out of forward

    out = mlp_forward(x, kparams)
    out = jax.block_until_ready(out)
    assert out.shape == (n, widths[-1])
    assert out.dtype == jnp.float32

    # Tight check against a same-precision (bf16 matmul) JAX reference.
    ref_bf16 = mlp_reference_bf16(x, params)
    assert jnp.allclose(out, ref_bf16, atol=2e-3, rtol=2e-3), "mismatch vs bf16 reference"

    # Loose sanity check against the exact f32 module semantics
    # (slack accounts for bf16 matmul inputs on the MXU).
    ref_f32 = mlp_reference_f32(x, params)
    assert jnp.allclose(out, ref_f32, atol=8e-2, rtol=8e-2), "mismatch vs f32 reference"

    print("KERNEL_OK")
</pallas_src>

<mosaic_0001>
module attributes {stable_mosaic.version = 11 : i64} {
  func.func @mlp_kernel(%arg0: i32, %arg1: memref<8x16xf32, #tpu.memory_space<vmem>>, %arg2: memref<16x32xbf16, #tpu.memory_space<vmem>>, %arg3: memref<1x32xf32, #tpu.memory_space<vmem>>, %arg4: memref<32x32xbf16, #tpu.memory_space<vmem>>, %arg5: memref<1x32xf32, #tpu.memory_space<vmem>>, %arg6: memref<32x16xbf16, #tpu.memory_space<vmem>>, %arg7: memref<1x16xf32, #tpu.memory_space<vmem>>, %arg8: memref<1x16xf32, #tpu.memory_space<vmem>>, %arg9: memref<1x16xf32, #tpu.memory_space<vmem>>, %arg10: memref<8x16xf32, #tpu.memory_space<vmem>>) attributes {dimension_semantics = [#tpu.dimension_semantics<parallel>], iteration_bounds = array<i64: 1>, scalar_prefetch = 0 : i64, scratch_operands = 0 : i64, tpu.core_type = #tpu.core_type<tc>, window_params = [{transform_indices = @transform_0, window_bounds = array<i64: 8, 16>}, {pipeline_mode = #tpu.pipeline_mode<synchronous>, transform_indices = @transform_1, window_bounds = array<i64: 16, 32>}, {pipeline_mode = #tpu.pipeline_mode<synchronous>, transform_indices = @transform_2, window_bounds = array<i64: 1, 32>}, {pipeline_mode = #tpu.pipeline_mode<synchronous>, transform_indices = @transform_3, window_bounds = array<i64: 32, 32>}, {pipeline_mode = #tpu.pipeline_mode<synchronous>, transform_indices = @transform_4, window_bounds = array<i64: 1, 32>}, {pipeline_mode = #tpu.pipeline_mode<synchronous>, transform_indices = @transform_5, window_bounds = array<i64: 32, 16>}, {pipeline_mode = #tpu.pipeline_mode<synchronous>, transform_indices = @transform_6, window_bounds = array<i64: 1, 16>}, {pipeline_mode = #tpu.pipeline_mode<synchronous>, transform_indices = @transform_7, window_bounds = array<i64: 1, 16>}, {pipeline_mode = #tpu.pipeline_mode<synchronous>, transform_indices = @transform_8, window_bounds = array<i64: 1, 16>}, {transform_indices = @transform_9, window_bounds = array<i64: 8, 16>}]} {
    %c0 = arith.constant 0 : index
    %c0_0 = arith.constant 0 : index
    %0 = vector.load %arg1[%c0, %c0_0] : memref<8x16xf32, #tpu.memory_space<vmem>>, vector<8x16xf32>
    %1 = arith.truncf %0 : vector<8x16xf32> to vector<8x16xbf16>
    %c0_1 = arith.constant 0 : index
    %c0_2 = arith.constant 0 : index
    %2 = vector.load %arg2[%c0_1, %c0_2] : memref<16x32xbf16, #tpu.memory_space<vmem>>, vector<16x32xbf16>
    %cst = arith.constant dense<0.000000e+00> : vector<8x32xf32>
    %3 = tpu.matmul %1, %2, %cst {dimension_numbers = #tpu.dot_dimension_numbers<[1], [0], [0], [1], [0, 0, 1, 1], [], []>} : vector<8x16xbf16>, vector<16x32xbf16>, vector<8x32xf32> -> vector<8x32xf32>
    %c0_3 = arith.constant 0 : index
    %c0_4 = arith.constant 0 : index
    %4 = vector.load %arg3[%c0_3, %c0_4] : memref<1x32xf32, #tpu.memory_space<vmem>>, vector<1x32xf32>
    %5 = vector.broadcast %4 : vector<1x32xf32> to vector<8x32xf32>
    %6 = arith.addf %3, %5 : vector<8x32xf32>
    %cst_5 = arith.constant 0.000000e+00 : f32
    %7 = vector.broadcast %cst_5 : f32 to vector<8x32xf32>
    %8 = arith.maximumf %6, %7 : vector<8x32xf32>
    %9 = arith.truncf %8 : vector<8x32xf32> to vector<8x32xbf16>
    %c0_6 = arith.constant 0 : index
    %c0_7 = arith.constant 0 : index
    %10 = vector.load %arg4[%c0_6, %c0_7] : memref<32x32xbf16, #tpu.memory_space<vmem>>, vector<32x32xbf16>
    %cst_8 = arith.constant dense<0.000000e+00> : vector<8x32xf32>
    %11 = tpu.matmul %9, %10, %cst_8 {dimension_numbers = #tpu.dot_dimension_numbers<[1], [0], [0], [1], [0, 0, 1, 1], [], []>} : vector<8x32xbf16>, vector<32x32xbf16>, vector<8x32xf32> -> vector<8x32xf32>
    %c0_9 = arith.constant 0 : index
    %c0_10 = arith.constant 0 : index
    %12 = vector.load %arg5[%c0_9, %c0_10] : memref<1x32xf32, #tpu.memory_space<vmem>>, vector<1x32xf32>
    %13 = vector.broadcast %12 : vector<1x32xf32> to vector<8x32xf32>
    %14 = arith.addf %11, %13 : vector<8x32xf32>
    %cst_11 = arith.constant 0.000000e+00 : f32
    %15 = vector.broadcast %cst_11 : f32 to vector<8x32xf32>
    %16 = arith.maximumf %14, %15 : vector<8x32xf32>
    %17 = arith.truncf %16 : vector<8x32xf32> to vector<8x32xbf16>
    %c0_12 = arith.constant 0 : index
    %c0_13 = arith.constant 0 : index
    %18 = vector.load %arg6[%c0_12, %c0_13] : memref<32x16xbf16, #tpu.memory_space<vmem>>, vector<32x16xbf16>
    %cst_14 = arith.constant dense<0.000000e+00> : vector<8x16xf32>
    %19 = tpu.matmul %17, %18, %cst_14 {dimension_numbers = #tpu.dot_dimension_numbers<[1], [0], [0], [1], [0, 0, 1, 1], [], []>} : vector<8x32xbf16>, vector<32x16xbf16>, vector<8x16xf32> -> vector<8x16xf32>
    %c0_15 = arith.constant 0 : index
    %c0_16 = arith.constant 0 : index
    %20 = vector.load %arg7[%c0_15, %c0_16] : memref<1x16xf32, #tpu.memory_space<vmem>>, vector<1x16xf32>
    %21 = vector.broadcast %20 : vector<1x16xf32> to vector<8x16xf32>
    %22 = arith.addf %19, %21 : vector<8x16xf32>
    %cst_17 = arith.constant dense<0.000000e+00> : vector<8xf32>
    %23 = vector.multi_reduction <add>, %22, %cst_17 [1] : vector<8x16xf32> to vector<8xf32>
    %24 = vector.shape_cast %23 : vector<8xf32> to vector<8x1xf32>
    %cst_18 = arith.constant 1.600000e+01 : f32
    %25 = vector.broadcast %cst_18 : f32 to vector<8x1xf32>
    %26 = arith.divf %24, %25 : vector<8x1xf32>
    %27 = vector.broadcast %26 : vector<8x1xf32> to vector<8x16xf32>
    %28 = arith.subf %22, %27 : vector<8x16xf32>
    %29 = arith.mulf %28, %28 : vector<8x16xf32>
    %cst_19 = arith.constant dense<0.000000e+00> : vector<8xf32>
    %30 = vector.multi_reduction <add>, %29, %cst_19 [1] : vector<8x16xf32> to vector<8xf32>
    %31 = vector.shape_cast %30 : vector<8xf32> to vector<8x1xf32>
    %cst_20 = arith.constant 1.600000e+01 : f32
    %32 = vector.broadcast %cst_20 : f32 to vector<8x1xf32>
    %33 = arith.divf %31, %32 : vector<8x1xf32>
    %cst_21 = arith.constant 9.99999974E-6 : f32
    %34 = vector.broadcast %cst_21 : f32 to vector<8x1xf32>
    %35 = arith.addf %33, %34 : vector<8x1xf32>
    %36 = math.rsqrt %35 : vector<8x1xf32>
    %37 = vector.broadcast %36 : vector<8x1xf32> to vector<8x16xf32>
    %38 = arith.mulf %28, %37 : vector<8x16xf32>
    %c0_22 = arith.constant 0 : index
    %c0_23 = arith.constant 0 : index
    %39 = vector.load %arg8[%c0_22, %c0_23] : memref<1x16xf32, #tpu.memory_space<vmem>>, vector<1x16xf32>
    %40 = vector.broadcast %39 : vector<1x16xf32> to vector<8x16xf32>
    %41 = arith.mulf %38, %40 : vector<8x16xf32>
    %c0_24 = arith.constant 0 : index
    %c0_25 = arith.constant 0 : index
    %42 = vector.load %arg9[%c0_24, %c0_25] : memref<1x16xf32, #tpu.memory_space<vmem>>, vector<1x16xf32>
    %43 = vector.broadcast %42 : vector<1x16xf32> to vector<8x16xf32>
    %44 = arith.addf %41, %43 : vector<8x16xf32>
    %c0_26 = arith.constant 0 : index
    %c0_27 = arith.constant 0 : index
    %45 = vector.load %arg10[%c0_26, %c0_27] : memref<8x16xf32, #tpu.memory_space<vmem>>, vector<8x16xf32>
    tpu.vector_store %arg10[%c0_26, %c0_27], %44 {strides = array<i32>} : memref<8x16xf32, #tpu.memory_space<vmem>>, vector<8x16xf32>,
    return
  }
  func.func @transform_0(%arg0: i32) -> (i32, i32) {
    %c0_i32 = arith.constant 0 : i32
    %c0_i32_0 = arith.constant 0 : i32
    return %arg0, %c0_i32 : i32, i32
  }
  func.func @transform_1(%arg0: i32) -> (i32, i32) {
    %c0_i32 = arith.constant 0 : i32
    %c0_i32_0 = arith.constant 0 : i32
    %c0_i32_1 = arith.constant 0 : i32
    return %c0_i32, %c0_i32_0 : i32, i32
  }
  func.func @transform_2(%arg0: i32) -> (i32, i32) {
    %c0_i32 = arith.constant 0 : i32
    %c0_i32_0 = arith.constant 0 : i32
    %c0_i32_1 = arith.constant 0 : i32
    return %c0_i32, %c0_i32_0 : i32, i32
  }
  func.func @transform_3(%arg0: i32) -> (i32, i32) {
    %c0_i32 = arith.constant 0 : i32
    %c0_i32_0 = arith.constant 0 : i32
    %c0_i32_1 = arith.constant 0 : i32
    return %c0_i32, %c0_i32_0 : i32, i32
  }
  func.func @transform_4(%arg0: i32) -> (i32, i32) {
    %c0_i32 = arith.constant 0 : i32
    %c0_i32_0 = arith.constant 0 : i32
    %c0_i32_1 = arith.constant 0 : i32
    return %c0_i32, %c0_i32_0 : i32, i32
  }
  func.func @transform_5(%arg0: i32) -> (i32, i32) {
    %c0_i32 = arith.constant 0 : i32
    %c0_i32_0 = arith.constant 0 : i32
    %c0_i32_1 = arith.constant 0 : i32
    return %c0_i32, %c0_i32_0 : i32, i32
  }
  func.func @transform_6(%arg0: i32) -> (i32, i32) {
    %c0_i32 = arith.constant 0 : i32
    %c0_i32_0 = arith.constant 0 : i32
    %c0_i32_1 = arith.constant 0 : i32
    return %c0_i32, %c0_i32_0 : i32, i32
  }
  func.func @transform_7(%arg0: i32) -> (i32, i32) {
    %c0_i32 = arith.constant 0 : i32
    %c0_i32_0 = arith.constant 0 : i32
    %c0_i32_1 = arith.constant 0 : i32
    return %c0_i32, %c0_i32_0 : i32, i32
  }
  func.func @transform_8(%arg0: i32) -> (i32, i32) {
    %c0_i32 = arith.constant 0 : i32
    %c0_i32_0 = arith.constant 0 : i32
    %c0_i32_1 = arith.constant 0 : i32
    return %c0_i32, %c0_i32_0 : i32, i32
  }
  func.func @transform_9(%arg0: i32) -> (i32, i32) {
    %c0_i32 = arith.constant 0 : i32
    %c0_i32_0 = arith.constant 0 : i32
    return %arg0, %c0_i32 : i32, i32
  }
}

</mosaic_0001>

<bundles_post_ra>
// kernel: tpu_custom_call.1
= control target key start
LH: loop header
LB: loop body
LE: loop exit
PB: predicated region body
PF: predicated region fallthrough
CT: control target
= control target key end

     0   :  { %14 = vsyncpa [#allocation3], 0  ;;  %s510_s0 = inlined_call_operand.vmem [shape: f32[8,16], index: 0, kind: input, shape index: {}]   ;;  %s511_s1 = inlined_call_operand.hbm [shape: bf16[16,32], index: 1, kind: input, shape index: {}]   ;;  %s512_s2 = inlined_call_operand.vmem [shape: f32[1,32], index: 2, kind: input, shape index: {}]   ;;  %s513_s3 = inlined_call_operand.vmem [shape: bf16[32,32], index: 3, kind: input, shape index: {}]   ;;  %s514_s4 = inlined_call_operand.vmem [shape: f32[1,32], index: 4, kind: input, shape index: {}]   ;;  %s515_s5 = inlined_call_operand.vmem [shape: bf16[32,16], index: 5, kind: input, shape index: {}]   ;;  %s516_s6 = inlined_call_operand.vmem [shape: f32[1,16], index: 6, kind: input, shape index: {}]   ;;  %s517_s7 = inlined_call_operand.vmem [shape: f32[1,16], index: 7, kind: input, shape index: {}]   ;;  %s518_s8 = inlined_call_operand.vmem [shape: f32[1,16], index: 8, kind: input, shape index: {}]   ;;  %s519_s9 = inlined_call_operand.hbm [shape: f32[8,16], index: 9, kind: output, shape index: {}]  }
   0x1   :  { %15 = vsyncpa [#allocation4], 0  ;;  %s396_s30 = smov [#allocation2]   ;;  %s348_s13 = scalar_lea.hbm %s511_s1, 128 }
   0x2   :  { %s23_s10 = sshll.u32 %s396_s30, 4  ;;  %p349_p0 = scmp.ne.s32.totalorder %s511_s1, %s348_s13  ;;  %s24_s10 = int_to_ptr.vmem [resolvable:$true] %s23_s10 }
   0x3   :  { %p352_p1 = scmp.lt.u32.totalorder %s348_s13, %s511_s1 }
   0x5   :  { %p354_p2 = pnand %p352_p1, %p349_p0 }
   0x7   :  { %357 = shalt.err (!%p354_p2)
}
   0x8   :  { %s358_s18 = scalar_lea.vmem %s24_s10, 128  ;;  %p363_p4 = scmp.lt.s32.totalorder %s24_s10, %s24_s10 }
   0x9   :  { %p359_p3 = scmp.ne.s32.totalorder %s24_s10, %s358_s18  ;;  %p364_p5 = scmp.lt.s32.totalorder %s358_s18, %s358_s18 }
   0xb   :  { %p365_p6 = por %p364_p5, %p363_p4 }
   0xd   :  { %p366_p7 = pnand %p365_p6, %p359_p3 }
   0xf   :  { %369 = shalt.err (!%p366_p7)
}
  0x10   :  { %s397_s19 = smov 64   ;;  %s398_s20 = smov 4  }
  0x11   :  { %29 = dma.hbm_to_vmem [thread:$0]  %s511_s1, 128, %s24_s10, [#allocation3], %s397_s19, %s397_s19, %s398_s20  }
  0x12   :  { %392 = dma.done.wait [#allocation3], 128  }
  0x13   :  { %393 = vsyncadd [#allocation3], 4294967168  ;;  %v399_v0 = vmov 0.0   ;;  %vm400_vm0 = vmmov 0   ;;  %v341_v1 = vld [vmem:[#allocation2] sm:$0xff]   ;;  %vm65_vm1 = vcmask 130048  }
  0x14   :  { %313 = vmatprep.subr.bf16.mxu0 %v399_v0  ;;  %315 = vmatprep.mubr.msk.bf16.mxu0 %vm400_vm0, %v399_v0  ;;  %v48_v2 = vld [vmem:[%s510_s0] sm:$0xff]  ;;  %v343_v5 = vld [vmem:[%s513_s3 + $0x8] sm:$0xff]   ;;  %vm134_vm2 = vcmask 261120   ;;  %s401_s15 = smov [#allocation5]  }
  0x15   :  { %319 = vmatprep.subr.bf16.mxu1 %v399_v0  ;;  %323 = vmatprep.mubr.msk.bf16.mxu1 %vm400_vm0, %v399_v0  ;;  %v49_v3 = vpack.c.bf16 %v48_v2, %v48_v2  ;;  %v342_v4 = vld [vmem:[%s513_s3] sm:$0xff]   ;;  %v345_v15 = vld [vmem:[%s515_s5 + $0x8] sm:$0xff]   ;;  %s283_s16 = sshll.u32 %s401_s15, 4  ;;  %s284_s16 = int_to_ptr.vmem [resolvable:$true] %s283_s16 }
  0x16   :  { %314 = vmatpush3.bf16.msra.mxu0 %v341_v1  ;;  %320 = vmatpush3.bf16.msra.mxu1 %v342_v4  ;;  %v344_v6 = vld [vmem:[%s515_s5] sm:$0xff]   ;;  %s370_s17 = scalar_lea.vmem %s284_s16, 128  ;;  %p375_p9 = scmp.lt.s32.totalorder %s284_s16, %s284_s16 }
  0x17   :  { %327 = vmatprep.subr.bf16.mxu0 %v399_v0  ;;  %321 = vmatprep.subr.bf16.mxu1 %v399_v0  ;;  %v292_v7 = vld [vmem:[%s512_s2] ss:$0 sm:$0xff]  ;;  %p371_p8 = scmp.ne.s32.totalorder %s284_s16, %s370_s17  ;;  %p376_p10 = scmp.lt.s32.totalorder %s370_s17, %s370_s17 }
  0x18   :  { %v295_v16 = vld [vmem:[%s514_s4] ss:$0 sm:$0xff] }
  0x19   :  { %316 = vmatmul.mubr.msk.bf16.vlgmr.msra.gmra.mrb[0].mxu0 %vm65_vm1, %v49_v3  ;;  %v299_v24 = vld [vmem:[%s516_s6] ss:$0 sm:$0xff]  ;;  %p377_p11 = por %p376_p10, %p375_p9 }
  0x1a   :  { %331 = vmatprep.mubr.msk.bf16.mxu0 %vm400_vm0, %v399_v0  ;;  %322 = vmatpush3.bf16.msra.mxu1 %v343_v5  ;;  %v303_v40 = vld [vmem:[%s517_s7] ss:$0 sm:$0xff] }
  0x1b   :  { %328 = vmatpush3.bf16.msra.mxu0 %v344_v6  ;;  %v304_v42 = vld [vmem:[%s518_s8] ss:$0 sm:$0xff]  ;;  %p378_p12 = pnand %p377_p11, %p371_p8 }
  0x1c   :  { %329 = vmatprep.subr.bf16.mxu0 %v399_v0 }
  0x1f   :  { %330 = vmatpush3.bf16.msra.mxu0 %v345_v15 }
  0xec   :  { %v103_v8 = vpop.f32.mrb[0].mxu0 }
  0xed   :  { %v104_v9 = vadd.f32 %v292_v7, %v103_v8  ;;  %v317_v10 = vpop.f32.mrb[1].mxu0 }
  0xee   :  { %v106_v11 = vpop.f32.mrb[2].mxu0 }
  0xef   :  { %v109_v12 = vmax.f32 %v104_v9, 0.0  ;;  %v318_v13 = vpop.f32.mrb[3].mxu0 }
  0xf1   :  { %v110_v14 = vpack.c.bf16 %v109_v12, %v109_v12 }
  0xf3   :  { %324 = vmatmul.mubr.msk.bf16.vlgmr.msra.gmra.mrb[0].mxu1 %vm134_vm2, %v110_v14 }
 0x1c6   :  { %v172_v17 = vpop.f32.mrb[0].mxu1 }
 0x1c7   :  { %v173_v18 = vadd.f32 %v295_v16, %v172_v17  ;;  %v325_v19 = vpop.f32.mrb[1].mxu1 }
 0x1c8   :  { %v175_v20 = vpop.f32.mrb[2].mxu1 }
 0x1c9   :  { %v178_v21 = vmax.f32 %v173_v18, 0.0  ;;  %v326_v22 = vpop.f32.mrb[3].mxu1 }
 0x1cb   :  { %v179_v23 = vpack.c.bf16 %v178_v21, %v178_v21 }
 0x1cd   :  { %332 = vmatmul.mubr.msk.bf16.vlgmr.msra.gmra.mrb[4].mxu0 %vm134_vm2, %v179_v23 }
 0x2a0   :  { %v240_v25 = vpop.f32.mrb[4].mxu0 }
 0x2a1   :  { %v241_v26 = vadd.f32 %v299_v24, %v240_v25  ;;  %v333_v27 = vpop.f32.mrb[5].mxu0 }
 0x2a2   :  { %v243_v28 = vpop.f32.mrb[6].mxu0 }
 0x2a3   :  { %v334_v29 = vpop.f32.mrb[7].mxu0  ;;  %v246_v30 = vsel %vm65_vm1, %v241_v26, 0.0 }
 0x2a4   :  { %247 = vadd.xlane.f32.xlu0 %v246_v30 }
 0x331   :  { %v248_v31 = vpop.xlane.xlu0 %247 }
 0x332   :  { %v250_v32 = vmul.f32 0.0625, %v248_v31 }
 0x334   :  { %v251_v33 = vsub.f32 %v241_v26, %v250_v32 }
 0x336   :  { %v252_v34 = vmul.f32 %v251_v33, %v251_v33 }
 0x338   :  { %v253_v35 = vsel %vm65_vm1, %v252_v34, 0.0 }
 0x339   :  { %254 = vadd.xlane.f32.xlu0 %v253_v35 }
 0x3c6   :  { %v255_v36 = vpop.xlane.xlu0 %254 }
 0x3c7   :  { %v256_v37 = vmul.f32 0.0625, %v255_v36 }
 0x3c9   :  { %v257_v38 = vadd.f32 1e-05, %v256_v37 }
 0x3cb   :  { %346 = vrsqrt.f32 %v257_v38 }
 0x3d5   :  { %v347_v39 = vpop.eup %346 }
 0x3d6   :  { %v259_v41 = vmul.f32 %v347_v39, %v251_v33 }
 0x3d8   :  { %v267_v43 = vmul.f32 %v303_v40, %v259_v41 }
 0x3da   :  { %v275_v44 = vadd.f32 %v304_v42, %v267_v43 }
 0x3dc   :  { %276 = vst.msk [vmem:[#allocation5] sm:$0xff] %vm65_vm1, %v275_v44 }
 0x3dd   :  { %381 = shalt.err (!%p378_p12)
}
 0x3de   :  { %s382_s19 = scalar_lea.hbm %s519_s9, 128 }
 0x3df   :  { %p383_p13 = scmp.ne.s32.totalorder %s519_s9, %s382_s19  ;;  %p386_p0 = scmp.lt.u32.totalorder %s382_s19, %s519_s9 }
 0x3e1   :  { %p388_p1 = pnand %p386_p0, %p383_p13 }
 0x3e3   :  { %391 = shalt.err (!%p388_p1)
}
 0x3e4   :  { %286 = dma.vmem_to_hbm [thread:$0]  %s284_s16, 128, %s519_s9, [#allocation4]  }
 0x3e5   :  { %394 = dma.done.wait [#allocation4], 128  }
 0x3e6   :  { %395 = vsyncadd [#allocation4], 4294967168 }
 0x3e7   :  { %290 = vsyncpa [#allocation3], 1 }
 0x3e8   :  { %291 = vsyncpa [#allocation4], 1 }

</bundles_post_ra>
